<compile_context>
chip_gen: v6e
topology: v6e:2x2x1
jax: 0.10.0
libtpu: 0.0.40
codegen_flags: <defaults>
</compile_context>

<pallas_src>
import jax
import jax.numpy as jnp
from jax import lax
from jax.experimental import pallas as pl
from jax.experimental.pallas import tpu as pltpu


def _round_up(x, m):
    return (x + m - 1) // m * m


def _embedding_mlp_kernel(ids_ref, table_ref, wt_ref, bias_ref, out_ref):
    """One grid step: TN tokens -> (TN, E_pad) outputs.

    ids_ref:   (TN, 1)         int32 VMEM tile of token ids
    table_ref: (V_pad, C_pad)  f32 VMEM, resident across all grid steps
    wt_ref:    (C_pad, E_pad)  f32 VMEM, resident (Linear weight, transposed)
    bias_ref:  (1, E_pad)      f32 VMEM, resident
    out_ref:   (TN, E_pad)     f32 VMEM output tile
    """
    tn = out_ref.shape[0]
    v_pad = table_ref.shape[0]

    # Row gather as a one-hot matmul on the MXU (each output element is exactly
    # one product 1.0 * table[row, c] under HIGHEST precision).
    ids = ids_ref[...]                                          # (TN, 1) int32
    iota = lax.broadcasted_iota(jnp.int32, (tn, v_pad), 1)      # (TN, V_pad)
    onehot = (iota == ids).astype(jnp.float32)                  # (TN, V_pad)
    emb = jnp.dot(onehot, table_ref[...],
                  preferred_element_type=jnp.float32,
                  precision=lax.Precision.HIGHEST)              # (TN, C_pad)

    # Compress (nn.Linear): (TN, C_pad) @ (C_pad, E_pad) + bias.
    y = jnp.dot(emb, wt_ref[...],
                preferred_element_type=jnp.float32,
                precision=lax.Precision.HIGHEST)                # (TN, E_pad)

    # Lane-dense (E_pad multiple of 128) unmasked store.
    out_ref[...] = y + bias_ref[...]


def prepare_embedding_mlp_params(emb_table, lin_w, lin_b):
    """Pad weights to TPU-friendly layouts ONCE; reuse across forward calls."""
    V, C = emb_table.shape
    E = lin_w.shape[0]
    V_pad = _round_up(V, 128)   # lane dim of the in-kernel one-hot
    C_pad = _round_up(C, 128)
    E_pad = _round_up(E, 128)

    table_p = jnp.zeros((V_pad, C_pad), jnp.float32).at[:V, :C].set(
        emb_table.astype(jnp.float32))
    wt_p = jnp.zeros((C_pad, E_pad), jnp.float32).at[:C, :E].set(
        lin_w.astype(jnp.float32).T)
    bias_p = jnp.zeros((1, E_pad), jnp.float32).at[0, :E].set(
        lin_b.astype(jnp.float32))

    dims = dict(V=V, C=C, E=E, V_pad=V_pad, C_pad=C_pad, E_pad=E_pad)
    return table_p, wt_p, bias_p, dims


def embedding_mlp_forward(ids_2d, table_p, wt_p, bias_p, dims, *, tile_n=256):
    """ids_2d: (B, S) int token ids -> (B, S, E) f32."""
    B, S = ids_2d.shape
    N = B * S
    V, E = dims["V"], dims["E"]
    V_pad, C_pad, E_pad = dims["V_pad"], dims["C_pad"], dims["E_pad"]

    resident_bytes = 4 * (V_pad * C_pad + C_pad * E_pad)
    if resident_bytes > (40 << 20):
        # TODO(synk): add an HBM double-buffered row-DMA gather fallback for
        # embedding tables too large to keep VMEM-resident (v7x: 64 MiB/TC).
        raise NotImplementedError("embedding table exceeds VMEM-resident budget")

    # Large token tiles (review: tiny tiles are step-overhead dominated); clamp
    # to the actual token count for small problems.
    TN = _round_up(min(tile_n, max(N, 8)), 8)
    N_pad = _round_up(N, TN)
    num_tiles = N_pad // TN

    # nn.Embedding raises on out-of-range ids; we clamp defensively instead
    # (documented semantic deviation).
    ids_flat = jnp.clip(ids_2d.reshape(-1), 0, V - 1).astype(jnp.int32)
    ids_col = jnp.pad(ids_flat, (0, N_pad - N)).reshape(N_pad, 1)

    # VMEM budget from the actual buffers: resident weights + double-buffered
    # ids/out tiles, with headroom.
    tile_bytes = 2 * (TN * E_pad * 4) + 2 * (TN * 128 * 4)
    vmem_limit = int(1.5 * (resident_bytes + 8 * E_pad * 4 + tile_bytes)) + (2 << 20)
    vmem_limit = min(max(vmem_limit, 4 << 20), 64 << 20)

    cost = pl.CostEstimate(
        flops=2 * N_pad * V_pad * C_pad + 2 * N_pad * C_pad * E_pad + N_pad * E_pad,
        transcendentals=0,
        bytes_accessed=4 * (V_pad * C_pad + C_pad * E_pad + E_pad
                            + N_pad + N_pad * E_pad),
    )

    out_flat = pl.pallas_call(
        _embedding_mlp_kernel,
        out_shape=jax.ShapeDtypeStruct((N_pad, E_pad), jnp.float32),
        grid=(num_tiles,),
        in_specs=[
            pl.BlockSpec((TN, 1), lambda t: (t, 0)),           # ids tile
            pl.BlockSpec((V_pad, C_pad), lambda t: (0, 0)),    # emb table, resident
            pl.BlockSpec((C_pad, E_pad), lambda t: (0, 0)),    # W^T, resident
            pl.BlockSpec((1, E_pad), lambda t: (0, 0)),        # bias, resident
        ],
        out_specs=pl.BlockSpec((TN, E_pad), lambda t: (t, 0)),
        compiler_params=pltpu.CompilerParams(
            dimension_semantics=("parallel",),
            vmem_limit_bytes=vmem_limit,
        ),
        cost_estimate=cost,
    )(ids_col, table_p, wt_p, bias_p)

    return out_flat[:N, :E].reshape(B, S, E)


def reference(ids_2d, emb_table, lin_w, lin_b):
    emb = jnp.take(emb_table, ids_2d, axis=0)                   # (B, S, C)
    return jnp.einsum("bsc,ec->bse", emb, lin_w,
                      precision=lax.Precision.HIGHEST) + lin_b  # (B, S, E)


if __name__ == "__main__":
    # Module hyperparams (small, consistent with the forward pass)
    vocab_size = 32
    compress_dim = 16
    emb_dim = 32
    batch, seq = 2, 8

    key = jax.random.PRNGKey(0)
    k_emb, k_w, k_b, k_ids = jax.random.split(key, 4)

    # nn.Embedding.weight ~ N(0, 1)
    emb_table = jax.random.normal(k_emb, (vocab_size, compress_dim), dtype=jnp.float32)
    # nn.Linear: U(-1/sqrt(in), 1/sqrt(in)) for weight (out, in) and bias
    bound = 1.0 / (compress_dim ** 0.5)
    lin_w = jax.random.uniform(k_w, (emb_dim, compress_dim), jnp.float32, -bound, bound)
    lin_b = jax.random.uniform(k_b, (emb_dim,), jnp.float32, -bound, bound)

    # Input token ids (B, S)
    ids = jax.random.randint(k_ids, (batch, seq), 0, vocab_size, dtype=jnp.int32)

    # Pad/prepare weights once (hoisted out of the per-call path).
    table_p, wt_p, bias_p, dims = prepare_embedding_mlp_params(emb_table, lin_w, lin_b)

    out = embedding_mlp_forward(ids, table_p, wt_p, bias_p, dims)
    out = jax.block_until_ready(out)

    ref = reference(ids, emb_table, lin_w, lin_b)
    assert out.shape == (batch, seq, emb_dim)
    max_err = float(jnp.max(jnp.abs(out - ref)))
    assert jnp.allclose(out, ref, atol=1e-5, rtol=1e-5), max_err

    print("KERNEL_OK")
</pallas_src>

<mosaic_0001>
module attributes {stable_mosaic.version = 11 : i64} {
  func.func @_embedding_mlp_kernel(%arg0: i32, %arg1: memref<16x1xi32, #tpu.memory_space<vmem>>, %arg2: memref<128x128xf32, #tpu.memory_space<vmem>>, %arg3: memref<128x128xf32, #tpu.memory_space<vmem>>, %arg4: memref<1x128xf32, #tpu.memory_space<vmem>>, %arg5: memref<16x128xf32, #tpu.memory_space<vmem>>) attributes {dimension_semantics = [#tpu.dimension_semantics<parallel>], iteration_bounds = array<i64: 1>, scalar_prefetch = 0 : i64, scratch_operands = 0 : i64, tpu.core_type = #tpu.core_type<tc>, window_params = [{transform_indices = @transform_0, window_bounds = array<i64: 16, 1>}, {pipeline_mode = #tpu.pipeline_mode<synchronous>, transform_indices = @transform_1, window_bounds = array<i64: 128, 128>}, {pipeline_mode = #tpu.pipeline_mode<synchronous>, transform_indices = @transform_2, window_bounds = array<i64: 128, 128>}, {pipeline_mode = #tpu.pipeline_mode<synchronous>, transform_indices = @transform_3, window_bounds = array<i64: 1, 128>}, {transform_indices = @transform_4, window_bounds = array<i64: 16, 128>}]} {
    %c0 = arith.constant 0 : index
    %c0_0 = arith.constant 0 : index
    %0 = vector.load %arg1[%c0, %c0_0] : memref<16x1xi32, #tpu.memory_space<vmem>>, vector<16x1xi32>
    %1 = tpu.iota {dimensions = array<i32: 1>} : vector<16x128xi32>
    %2 = vector.broadcast %0 : vector<16x1xi32> to vector<16x128xi32>
    %3 = arith.cmpi eq, %1, %2 : vector<16x128xi32>
    %4 = arith.extui %3 : vector<16x128xi1> to vector<16x128xi32>
    %5 = arith.sitofp %4 : vector<16x128xi32> to vector<16x128xf32>
    %c0_1 = arith.constant 0 : index
    %c0_2 = arith.constant 0 : index
    %6 = vector.load %arg2[%c0_1, %c0_2] : memref<128x128xf32, #tpu.memory_space<vmem>>, vector<128x128xf32>
    %cst = arith.constant dense<0.000000e+00> : vector<16x128xf32>
    %7 = tpu.matmul %5, %6, %cst {dimension_numbers = #tpu.dot_dimension_numbers<[1], [0], [0], [1], [0, 0, 1, 1], [], []>, precision = #tpu.contract_precision<fp32>} : vector<16x128xf32>, vector<128x128xf32>, vector<16x128xf32> -> vector<16x128xf32>
    %c0_3 = arith.constant 0 : index
    %c0_4 = arith.constant 0 : index
    %8 = vector.load %arg3[%c0_3, %c0_4] : memref<128x128xf32, #tpu.memory_space<vmem>>, vector<128x128xf32>
    %cst_5 = arith.constant dense<0.000000e+00> : vector<16x128xf32>
    %9 = tpu.matmul %7, %8, %cst_5 {dimension_numbers = #tpu.dot_dimension_numbers<[1], [0], [0], [1], [0, 0, 1, 1], [], []>, precision = #tpu.contract_precision<fp32>} : vector<16x128xf32>, vector<128x128xf32>, vector<16x128xf32> -> vector<16x128xf32>
    %c0_6 = arith.constant 0 : index
    %c0_7 = arith.constant 0 : index
    %10 = vector.load %arg4[%c0_6, %c0_7] : memref<1x128xf32, #tpu.memory_space<vmem>>, vector<1x128xf32>
    %11 = vector.broadcast %10 : vector<1x128xf32> to vector<16x128xf32>
    %12 = arith.addf %9, %11 : vector<16x128xf32>
    %c0_8 = arith.constant 0 : index
    %c0_9 = arith.constant 0 : index
    %13 = vector.load %arg5[%c0_8, %c0_9] : memref<16x128xf32, #tpu.memory_space<vmem>>, vector<16x128xf32>
    tpu.vector_store %arg5[%c0_8, %c0_9], %12 {strides = array<i32>} : memref<16x128xf32, #tpu.memory_space<vmem>>, vector<16x128xf32>,
    return
  }
  func.func @transform_0(%arg0: i32) -> (i32, i32) {
    %c0_i32 = arith.constant 0 : i32
    %c0_i32_0 = arith.constant 0 : i32
    return %arg0, %c0_i32 : i32, i32
  }
  func.func @transform_1(%arg0: i32) -> (i32, i32) {
    %c0_i32 = arith.constant 0 : i32
    %c0_i32_0 = arith.constant 0 : i32
    %c0_i32_1 = arith.constant 0 : i32
    return %c0_i32, %c0_i32_0 : i32, i32
  }
  func.func @transform_2(%arg0: i32) -> (i32, i32) {
    %c0_i32 = arith.constant 0 : i32
    %c0_i32_0 = arith.constant 0 : i32
    %c0_i32_1 = arith.constant 0 : i32
    return %c0_i32, %c0_i32_0 : i32, i32
  }
  func.func @transform_3(%arg0: i32) -> (i32, i32) {
    %c0_i32 = arith.constant 0 : i32
    %c0_i32_0 = arith.constant 0 : i32
    %c0_i32_1 = arith.constant 0 : i32
    return %c0_i32, %c0_i32_0 : i32, i32
  }
  func.func @transform_4(%arg0: i32) -> (i32, i32) {
    %c0_i32 = arith.constant 0 : i32
    %c0_i32_0 = arith.constant 0 : i32
    return %arg0, %c0_i32 : i32, i32
  }
}

</mosaic_0001>

<bundles_post_ra>
// kernel: tpu_custom_call.1
= control target key start
LH: loop header
LB: loop body
LE: loop exit
PB: predicated region body
PF: predicated region fallthrough
CT: control target
= control target key end

     0   :  { %9 = vsyncpa [#allocation3], 0  ;;  %s2975_s0 = inlined_call_operand.vmem [shape: s32[16,1], index: 0, kind: input, shape index: {}]   ;;  %s2976_s1 = inlined_call_operand.hbm [shape: f32[128,128], index: 1, kind: input, shape index: {}]   ;;  %s2977_s2 = inlined_call_operand.hbm [shape: f32[128,128], index: 2, kind: input, shape index: {}]   ;;  %s2978_s3 = inlined_call_operand.vmem [shape: f32[1,128], index: 3, kind: input, shape index: {}]   ;;  %s2979_s4 = inlined_call_operand.hbm [shape: f32[16,128], index: 4, kind: output, shape index: {}]  }
   0x1   :  { %10 = vsyncpa [#allocation6], 0 }
   0x2   :  { %11 = vsyncpa [#allocation4], 0  ;;  %s2209_s15 = smov [#allocation2]  }
   0x3   :  { %s19_s16 = sshll.u32 %s2209_s15, 4  ;;  %s20_s16 = int_to_ptr.vmem [resolvable:$true] %s19_s16 }
   0x4   :  { %s2151_s17 = scalar_lea.vmem %s20_s16, 2048  ;;  %p2156_p1 = scmp.lt.s32.totalorder %s20_s16, %s20_s16 }
   0x5   :  { %p2152_p0 = scmp.ne.s32.totalorder %s20_s16, %s2151_s17  ;;  %p2157_p2 = scmp.lt.s32.totalorder %s2151_s17, %s2151_s17 }
   0x7   :  { %p2158_p3 = por %p2157_p2, %p2156_p1 }
   0x9   :  { %p2159_p4 = pnand %p2158_p3, %p2152_p0 }
   0xb   :  { %2162 = shalt.err (!%p2159_p4)
}
   0xc   :  { %s2210_s18 = smov 128   ;;  %s2211_s19 = smov 8  }
   0xd   :  { %25 = dma.hbm_to_vmem [thread:$0]  %s2976_s1, 2048, %s20_s16, [#allocation3], %s2210_s18, %s2210_s18, %s2211_s19  }
   0xe   :  { %s2212_s22 = smov [#allocation5]  }
   0xf   :  { %s31_s23 = sshll.u32 %s2212_s22, 4  ;;  %s32_s23 = int_to_ptr.vmem [resolvable:$true] %s31_s23 }
  0x10   :  { %s2171_s24 = scalar_lea.vmem %s32_s23, 2048  ;;  %p2176_p6 = scmp.lt.s32.totalorder %s32_s23, %s32_s23 }
  0x11   :  { %p2172_p5 = scmp.ne.s32.totalorder %s32_s23, %s2171_s24  ;;  %p2177_p7 = scmp.lt.s32.totalorder %s2171_s24, %s2171_s24 }
  0x13   :  { %p2178_p8 = por %p2177_p7, %p2176_p6 }
  0x15   :  { %p2179_p9 = pnand %p2178_p8, %p2172_p5 }
  0x17   :  { %2182 = shalt.err (!%p2179_p9)
}
  0x18   :  { %37 = dma.hbm_to_vmem [thread:$0]  %s2977_s2, 2048, %s32_s23, [#allocation6], %s2210_s18, %s2210_s18, %s2211_s19  }
  0x19   :  { %2203 = dma.done.wait [#allocation3], 2048  }
  0x1a   :  { %2204 = vsyncadd [#allocation3], 4294965248 }
  0x1b   :  { %2205 = dma.done.wait [#allocation6], 2048  }
  0x1c   :  { %2206 = vsyncadd [#allocation6], 4294965248  ;;  %v2213_v0 = vmov 0   ;;  %v46_v1 = vld [vmem:[%s2975_s0] sm:$0xff]  ;;  %v47_v2 = vld [vmem:[%s2975_s0 + $0x8] sm:$0xff] }
  0x1d   :  { %2142 = vset.pattern.permute.xlu0 %v2213_v0  ;;  %v77_v3 = vld [vmem:[#allocation2 + $0x78] sm:$0xff]  ;;  %v76_v5 = vld [vmem:[#allocation2 + $0x70] sm:$0xff]  ;;  %v75_v6 = vld [vmem:[#allocation2 + $0x68] sm:$0xff] }
  0x1e   :  { %51 = vperm.xlu0 %2142, %v46_v1   ;;  %v2260_v4 = vand.u32 4294901760, %v77_v3  ;;  %v74_v7 = vld [vmem:[#allocation2 + $0x60] sm:$0xff]  ;;  %v2262_v8 = vand.u32 4294901760, %v76_v5  ;;  %v2264_v9 = vand.u32 4294901760, %v75_v6  ;;  %v73_v11 = vld [vmem:[#allocation2 + $0x58] sm:$0xff]  ;;  %v72_v12 = vld [vmem:[#allocation2 + $0x50] sm:$0xff] }
  0x1f   :  { %v2266_v10 = vand.u32 4294901760, %v74_v7  ;;  %v71_v13 = vld [vmem:[#allocation2 + $0x48] sm:$0xff]  ;;  %v2271_v15 = vand.u32 4294901760, %v73_v11  ;;  %v2274_v16 = vand.u32 4294901760, %v72_v12  ;;  %v70_v18 = vld [vmem:[#allocation2 + $0x40] sm:$0xff]  ;;  %v69_v35 = vld [vmem:[#allocation2 + $0x38] sm:$0xff] }
  0x20   :  { %v2269_v14 = vsub.f32 %v77_v3, %v2260_v4  ;;  %1714 = vmatprep.subr.mxu0 %v2260_v4  ;;  %v2276_v17 = vand.u32 4294901760, %v71_v13  ;;  %v2279_v19 = vsub.f32 %v76_v5, %v2262_v8  ;;  %v2282_v20 = vsub.f32 %v75_v6, %v2264_v9  ;;  %v68_v39 = vld [vmem:[#allocation2 + $0x30] sm:$0xff]  ;;  %v67_v40 = vld [vmem:[#allocation2 + $0x28] sm:$0xff]  ;;  %v66_v43 = vld [vmem:[#allocation2 + $0x20] sm:$0xff] }
  0x21   :  { %v2285_v21 = vsub.f32 %v74_v7, %v2266_v10  ;;  %1715 = vmatpush3.msra.mxu0 %v2260_v4  ;;  %v2288_v22 = vand.u32 4294901760, %v70_v18  ;;  %v2294_v24 = vsub.f32 %v73_v11, %v2271_v15  ;;  %v2297_v25 = vsub.f32 %v72_v12, %v2274_v16  ;;  %v65_v50 = vld [vmem:[#allocation2 + $0x18] sm:$0xff]  ;;  %v64_v57 = vld [vmem:[#allocation2 + $0x10] sm:$0xff]  ;;  %v63_v63 = vld [vmem:[#allocation2 + $0x8] sm:$0xff] }
  0x22   :  { %54 = vperm.xlu0 %2142, %v47_v2   ;;  %v2291_v23 = vand.u32 4294901760, %v2269_v14  ;;  %1716 = vmatprep.subr.mxu0 %v2262_v8  ;;  %v2301_v26 = vand.u32 4294901760, %v2279_v19  ;;  %v2304_v27 = vand.u32 4294901760, %v2282_v20  ;;  %v2311_v29 = vsub.f32 %v71_v13, %v2276_v17  ;;  %v62_v6 = vld [vmem:[#allocation2] sm:$0xff] }
  0x23   :  { %v2307_v28 = vand.u32 4294901760, %v2285_v21  ;;  %1717 = vmatpush3.msra.mxu0 %v2262_v8  ;;  %v2316_v31 = vand.u32 4294901760, %v2294_v24  ;;  %v2325_v34 = vsub.f32 %v70_v18, %v2288_v22  ;;  %v2330_v38 = vand.u32 4294901760, %v2297_v25 }
  0x24   :  { %v183_v30 = vsub.f32 %v2269_v14, %v2291_v23  ;;  %1718 = vmatprep.subr.mxu0 %v2264_v9  ;;  %v190_v32 = vsub.f32 %v2279_v19, %v2301_v26  ;;  %v197_v33 = vsub.f32 %v2282_v20, %v2304_v27  ;;  %v2334_v42 = vand.u32 4294901760, %v2311_v29 }
  0x25   :  { %1719 = vmatpush3.msra.mxu0 %v2264_v9  ;;  %v204_v37 = vsub.f32 %v2285_v21, %v2307_v28  ;;  %v211_v45 = vsub.f32 %v2294_v24, %v2316_v31  ;;  %v2339_v46 = vand.u32 4294901760, %v69_v35  ;;  %v2343_v47 = vand.u32 4294901760, %v2325_v34 }
  0x26   :  { %v184_v36 = vand.u32 4294901760, %v183_v30  ;;  %1720 = vmatprep.subr.mxu0 %v2266_v10  ;;  %v191_v41 = vand.u32 4294901760, %v190_v32  ;;  %v198_v44 = vand.u32 4294901760, %v197_v33  ;;  %v2346_v48 = vand.u32 4294901760, %v68_v39 }
  0x27   :  { %1721 = vmatpush3.msra.mxu0 %v2266_v10  ;;  %v2348_v49 = vand.u32 4294901760, %v67_v40  ;;  %v205_v51 = vand.u32 4294901760, %v204_v37  ;;  %v218_v52 = vsub.f32 %v2297_v25, %v2330_v38  ;;  %v2353_v53 = vsub.f32 %v69_v35, %v2339_v46 }
  0x28   :  { %1749 = vmatprep.subr.mxu1 %v184_v36  ;;  %1722 = vmatprep.subr.mxu0 %v2271_v15  ;;  %v2356_v54 = vand.u32 4294901760, %v66_v43  ;;  %v225_v55 = vsub.f32 %v2311_v29, %v2334_v42  ;;  %v2361_v56 = vsub.f32 %v68_v39, %v2346_v48  ;;  %v212_v58 = vand.u32 4294901760, %v211_v45 }
  0x29   :  { %1750 = vmatpush3.msra.mxu1 %v184_v36  ;;  %1723 = vmatpush3.msra.mxu0 %v2271_v15  ;;  %v2365_v59 = vand.u32 4294901760, %v2353_v53  ;;  %v2368_v60 = vsub.f32 %v67_v40, %v2348_v49  ;;  %v2371_v61 = vand.u32 4294901760, %v65_v50  ;;  %v232_v62 = vsub.f32 %v2325_v34, %v2343_v47 }
  0x2a   :  { %1751 = vmatprep.subr.mxu1 %v191_v41  ;;  %1724 = vmatprep.subr.mxu0 %v2274_v16  ;;  %v219_v0 = vand.u32 4294901760, %v218_v52  ;;  %v2377_v1 = vand.u32 4294901760, %v2361_v56  ;;  %v2380_v2 = vsub.f32 %v66_v43, %v2356_v54  ;;  %v2383_v3 = vand.u32 4294901760, %v64_v57 }
  0x2b   :  { %1752 = vmatpush3.msra.mxu1 %v191_v41  ;;  %1725 = vmatpush3.msra.mxu0 %v2274_v16  ;;  %v226_v5 = vand.u32 4294901760, %v225_v55  ;;  %v239_v7 = vsub.f32 %v2353_v53, %v2365_v59  ;;  %v2389_v11 = vand.u32 4294901760, %v2368_v60  ;;  %v2392_v12 = vsub.f32 %v65_v50, %v2371_v61 }
  0x2c   :  { %1753 = vmatprep.subr.mxu1 %v198_v44  ;;  %1726 = vmatprep.subr.mxu0 %v2276_v17  ;;  %v2395_v13 = vand.u32 4294901760, %v63_v63  ;;  %v233_v18 = vand.u32 4294901760, %v232_v62  ;;  %v246_v30 = vsub.f32 %v2361_v56, %v2377_v1  ;;  %v2401_v32 = vand.u32 4294901760, %v2380_v2 }
  0x2d   :  { %1754 = vmatpush3.msra.mxu1 %v198_v44  ;;  %1727 = vmatpush3.msra.mxu0 %v2276_v17  ;;  %v2404_v33 = vsub.f32 %v64_v57, %v2383_v3  ;;  %v2407_v35 = vand.u32 4294901760, %v62_v6  ;;  %v240_v36 = vand.u32 4294901760, %v239_v7  ;;  %v253_v37 = vsub.f32 %v2368_v60, %v2389_v11 }
  0x2e   :  { %1755 = vmatprep.subr.mxu1 %v205_v51  ;;  %1728 = vmatprep.subr.mxu0 %v2288_v22  ;;  %v2413_v39 = vand.u32 4294901760, %v2392_v12  ;;  %v2416_v40 = vsub.f32 %v63_v63, %v2395_v13  ;;  %v247_v41 = vand.u32 4294901760, %v246_v30  ;;  %v260_v43 = vsub.f32 %v2380_v2, %v2401_v32 }
  0x2f   :  { %1756 = vmatpush3.msra.mxu1 %v205_v51  ;;  %1729 = vmatpush3.msra.mxu0 %v2288_v22  ;;  %v2423_v44 = vand.u32 4294901760, %v2404_v33  ;;  %v2426_v45 = vsub.f32 %v62_v6, %v2407_v35  ;;  %v254_v50 = vand.u32 4294901760, %v253_v37  ;;  %v2214_v37 = vmov 0.0  }
  0x30   :  { %1757 = vmatprep.subr.mxu1 %v212_v58  ;;  %1730 = vmatprep.subr.mxu0 %v2339_v46  ;;  %v267_v51 = vsub.f32 %v2392_v12, %v2413_v39  ;;  %v2433_v52 = vand.u32 4294901760, %v2416_v40  ;;  %v261_v55 = vand.u32 4294901760, %v260_v43  ;;  %v2215_v43 = vmov 1.0  }
  0x31   :  { %1758 = vmatpush3.msra.mxu1 %v212_v58  ;;  %1731 = vmatpush3.msra.mxu0 %v2339_v46  ;;  %v274_v57 = vsub.f32 %v2404_v33, %v2423_v44  ;;  %v2440_v58 = vand.u32 4294901760, %v2426_v45 }
  0x32   :  { %1759 = vmatprep.subr.mxu1 %v219_v0  ;;  %1732 = vmatprep.subr.mxu0 %v2346_v48  ;;  %v268_v62 = vand.u32 4294901760, %v267_v51  ;;  %v281_v63 = vsub.f32 %v2416_v40, %v2433_v52 }
  0x33   :  { %1760 = vmatpush3.msra.mxu1 %v219_v0  ;;  %1733 = vmatpush3.msra.mxu0 %v2346_v48  ;;  %v275_v0 = vand.u32 4294901760, %v274_v57 }
  0x34   :  { %1761 = vmatprep.subr.mxu1 %v226_v5  ;;  %1734 = vmatprep.subr.mxu0 %v2348_v49  ;;  %v282_v6 = vand.u32 4294901760, %v281_v63 }
  0x35   :  { %1762 = vmatpush3.msra.mxu1 %v226_v5  ;;  %1735 = vmatpush3.msra.mxu0 %v2348_v49  ;;  %v288_v5 = vsub.f32 %v2426_v45, %v2440_v58 }
  0x36   :  { %1763 = vmatprep.subr.mxu1 %v233_v18  ;;  %1736 = vmatprep.subr.mxu0 %v2356_v54 }
  0x37   :  { %1764 = vmatpush3.msra.mxu1 %v233_v18  ;;  %1737 = vmatpush3.msra.mxu0 %v2356_v54  ;;  %v289_v7 = vand.u32 4294901760, %v288_v5  ;;  %v48_v18 = vlaneseq }
  0x38   :  { %1765 = vmatprep.subr.mxu1 %v240_v36  ;;  %1738 = vmatprep.subr.mxu0 %v2371_v61 }
  0x39   :  { %1766 = vmatpush3.msra.mxu1 %v240_v36  ;;  %1739 = vmatpush3.msra.mxu0 %v2371_v61  ;;  %v2454_v30 = vand.u32 127, %v48_v18 }
  0x3a   :  { %1767 = vmatprep.subr.mxu1 %v247_v41  ;;  %1740 = vmatprep.subr.mxu0 %v2383_v3 }
  0x3b   :  { %1768 = vmatpush3.msra.mxu1 %v247_v41  ;;  %1741 = vmatpush3.msra.mxu0 %v2383_v3 }
  0x3c   :  { %1769 = vmatprep.subr.mxu1 %v254_v50  ;;  %1742 = vmatprep.subr.mxu0 %v2395_v13 }
  0x3d   :  { %1770 = vmatpush3.msra.mxu1 %v254_v50  ;;  %1743 = vmatpush3.msra.mxu0 %v2395_v13 }
  0x3e   :  { %1771 = vmatprep.subr.mxu1 %v261_v55  ;;  %1744 = vmatprep.subr.mxu0 %v2407_v35 }
  0x3f   :  { %1772 = vmatpush3.msra.mxu1 %v261_v55  ;;  %1745 = vmatpush3.msra.mxu0 %v2407_v35 }
  0x40   :  { %1773 = vmatprep.subr.mxu1 %v268_v62  ;;  %1784 = vmatprep.subr.mxu0 %v2269_v14 }
  0x41   :  { %1774 = vmatpush3.msra.mxu1 %v268_v62 }
  0x42   :  { %1775 = vmatprep.subr.mxu1 %v275_v0 }
  0x43   :  { %1776 = vmatpush3.msra.mxu1 %v275_v0 }
  0x44   :  { %1777 = vmatprep.subr.mxu1 %v282_v6 }
  0x45   :  { %1778 = vmatpush3.msra.mxu1 %v282_v6 }
  0x46   :  { %1779 = vmatprep.subr.mxu1 %v289_v7 }
  0x47   :  { %1780 = vmatpush3.msra.mxu1 %v289_v7 }
  0x48   :  { %1819 = vmatprep.subr.mxu1 %v2260_v4 }
  0x99   :  { %v2456_v36 = vpop.permute.xlu0 %51 }
  0x9a   :  { %vm56_vm0 = vcmp.eq.s32.totalorder %v2454_v30, %v2456_v36 }
  0x9b   :  { %v1489_v41 = vsel %vm56_vm0, 1.0, %v2214_v37  ;;  %1781 = vmatprep.mubr.msk.f32.mxu1 %vm56_vm0, %v2215_v43 }
  0x9c   :  { %v160_v50 = vsub.f32 %v1489_v41, %v1489_v41 }
  0x9d   :  { %v2467_v51 = vpop.permute.xlu0 %54 }
  0x9e   :  { %vm57_vm1 = vcmp.eq.s32.totalorder %v2454_v30, %v2467_v51  ;;  %v161_v55 = vand.u32 4294901760, %v160_v50 }
  0x9f   :  { %v1490_v57 = vsel %vm57_vm1, 1.0, %v2214_v37  ;;  %1782 = vmatmul.mubr.msk.f32.vlgmr.msra.gmra.mxu1 %vm57_vm1, %v2215_v43  ;;  %v767_v37 = vld [vmem:[#allocation5 + $0x28] sm:$0xff] }
  0xa0   :  { %v2478_v62 = vsub.f32 %v1490_v57, %v1490_v57  ;;  %1820 = vmatpush3.msra.mxu1 %v2260_v4  ;;  %1851 = vmatprep.mubr.f32.mxu1 %v161_v55  ;;  %v162_v63 = vsub.f32 %v160_v50, %v161_v55  ;;  %v2736_v51 = vand.u32 4294901760, %v767_v37  ;;  %v766_v55 = vld [vmem:[#allocation5 + $0x20] sm:$0xff] }
  0xa1   :  { %1821 = vmatprep.subr.mxu1 %v2262_v8 }
  0xa2   :  { %1822 = vmatpush3.msra.mxu1 %v2262_v8  ;;  %v163_v0 = vand.u32 4294901760, %v162_v63  ;;  %v171_v5 = vand.u32 4294901760, %v2478_v62 }
  0xa3   :  { %1823 = vmatprep.subr.mxu1 %v2264_v9 }
  0xa4   :  { %1824 = vmatpush3.msra.mxu1 %v2264_v9  ;;  %1746 = vmatprep.mubr.f32.mxu0 %v163_v0  ;;  %v172_v6 = vsub.f32 %v2478_v62, %v171_v5  ;;  %v2746_v0 = vsub.f32 %v767_v37, %v2736_v51 }
  0xa5   :  { %1825 = vmatprep.subr.mxu1 %v2266_v10 }
  0xa6   :  { %1826 = vmatpush3.msra.mxu1 %v2266_v10  ;;  %v173_v7 = vand.u32 4294901760, %v172_v6  ;;  %v765_v6 = vld [vmem:[#allocation5 + $0x18] sm:$0xff] }
  0xa7   :  { %1827 = vmatprep.subr.mxu1 %v2271_v15 }
  0xa8   :  { %1828 = vmatpush3.msra.mxu1 %v2271_v15  ;;  %1747 = vmatmul.mubr.f32.vlgmr.msra.gmra.mxu0 %v173_v7 }
  0xa9   :  { %1785 = vmatpush3.msra.mxu0 %v2269_v14  ;;  %1829 = vmatprep.subr.mxu1 %v2274_v16 }
  0xaa   :  { %1786 = vmatprep.subr.mxu0 %v2279_v19  ;;  %1816 = vmatprep.mubr.f32.mxu0 %v160_v50 }
  0xab   :  { %1830 = vmatpush3.msra.mxu1 %v2274_v16  ;;  %1787 = vmatpush3.msra.mxu0 %v2279_v19 }
  0xac   :  { %1831 = vmatprep.subr.mxu1 %v2276_v17  ;;  %1788 = vmatprep.subr.mxu0 %v2282_v20 }
  0xad   :  { %1832 = vmatpush3.msra.mxu1 %v2276_v17  ;;  %1789 = vmatpush3.msra.mxu0 %v2282_v20 }
  0xae   :  { %1833 = vmatprep.subr.mxu1 %v2288_v22  ;;  %1790 = vmatprep.subr.mxu0 %v2285_v21 }
  0xaf   :  { %1834 = vmatpush3.msra.mxu1 %v2288_v22  ;;  %1791 = vmatpush3.msra.mxu0 %v2285_v21 }
  0xb0   :  { %1835 = vmatprep.subr.mxu1 %v2339_v46  ;;  %1792 = vmatprep.subr.mxu0 %v2294_v24 }
  0xb1   :  { %1836 = vmatpush3.msra.mxu1 %v2339_v46  ;;  %1793 = vmatpush3.msra.mxu0 %v2294_v24 }
  0xb2   :  { %1837 = vmatprep.subr.mxu1 %v2346_v48  ;;  %1794 = vmatprep.subr.mxu0 %v2297_v25 }
  0xb3   :  { %1838 = vmatpush3.msra.mxu1 %v2346_v48  ;;  %1795 = vmatpush3.msra.mxu0 %v2297_v25 }
  0xb4   :  { %1839 = vmatprep.subr.mxu1 %v2348_v49  ;;  %1796 = vmatprep.subr.mxu0 %v2311_v29 }
  0xb5   :  { %1840 = vmatpush3.msra.mxu1 %v2348_v49  ;;  %1797 = vmatpush3.msra.mxu0 %v2311_v29 }
  0xb6   :  { %1841 = vmatprep.subr.mxu1 %v2356_v54  ;;  %1798 = vmatprep.subr.mxu0 %v2325_v34 }
  0xb7   :  { %1842 = vmatpush3.msra.mxu1 %v2356_v54  ;;  %1799 = vmatpush3.msra.mxu0 %v2325_v34 }
  0xb8   :  { %1843 = vmatprep.subr.mxu1 %v2371_v61  ;;  %1800 = vmatprep.subr.mxu0 %v2353_v53 }
  0xb9   :  { %1844 = vmatpush3.msra.mxu1 %v2371_v61  ;;  %1801 = vmatpush3.msra.mxu0 %v2353_v53 }
  0xba   :  { %1845 = vmatprep.subr.mxu1 %v2383_v3  ;;  %1802 = vmatprep.subr.mxu0 %v2361_v56 }
  0xbb   :  { %1846 = vmatpush3.msra.mxu1 %v2383_v3  ;;  %1803 = vmatpush3.msra.mxu0 %v2361_v56 }
  0xbc   :  { %1847 = vmatprep.subr.mxu1 %v2395_v13  ;;  %1804 = vmatprep.subr.mxu0 %v2368_v60 }
  0xbd   :  { %1848 = vmatpush3.msra.mxu1 %v2395_v13  ;;  %1805 = vmatpush3.msra.mxu0 %v2368_v60 }
  0xbe   :  { %1849 = vmatprep.subr.mxu1 %v2407_v35  ;;  %1806 = vmatprep.subr.mxu0 %v2380_v2 }
  0xbf   :  { %1850 = vmatpush3.msra.mxu1 %v2407_v35  ;;  %1807 = vmatpush3.msra.mxu0 %v2380_v2 }
  0xc0   :  { %1852 = vmatmul.mubr.f32.vlgmr.msra.gmra.mxu1 %v171_v5  ;;  %1889 = vmatprep.subr.mxu1 %v2260_v4  ;;  %v2749_v5 = vand.u32 4294901760, %v766_v55 }
  0xc1   :  { %1808 = vmatprep.subr.mxu0 %v2392_v12  ;;  %1890 = vmatpush3.msra.mxu1 %v2260_v4  ;;  %v777_v4 = vld [vmem:[#allocation5 + $0x78] sm:$0xff] }
  0xc2   :  { %1921 = vmatprep.mubr.msk.f32.mxu1 %vm56_vm0, %v2215_v43  ;;  %1809 = vmatpush3.msra.mxu0 %v2392_v12 }
  0xc3   :  { %1891 = vmatprep.subr.mxu1 %v2262_v8  ;;  %1810 = vmatprep.subr.mxu0 %v2404_v33 }
  0xc4   :  { %1892 = vmatpush3.msra.mxu1 %v2262_v8  ;;  %1811 = vmatpush3.msra.mxu0 %v2404_v33  ;;  %v2625_v8 = vand.u32 4294901760, %v777_v4 }
  0xc5   :  { %1893 = vmatprep.subr.mxu1 %v2264_v9  ;;  %1812 = vmatprep.subr.mxu0 %v2416_v40 }
  0xc6   :  { %1894 = vmatpush3.msra.mxu1 %v2264_v9  ;;  %1813 = vmatpush3.msra.mxu0 %v2416_v40  ;;  %v776_v9 = vld [vmem:[#allocation5 + $0x70] sm:$0xff] }
  0xc7   :  { %1895 = vmatprep.subr.mxu1 %v2266_v10  ;;  %1814 = vmatprep.subr.mxu0 %v2426_v45  ;;  %v2630_v14 = vand.u32 4294901760, %v776_v9 }
  0xc8   :  { %1896 = vmatpush3.msra.mxu1 %v2266_v10  ;;  %1815 = vmatpush3.msra.mxu0 %v2426_v45  ;;  %v2628_v10 = vsub.f32 %v777_v4, %v2625_v8 }
  0xc9   :  { %1897 = vmatprep.subr.mxu1 %v2271_v15  ;;  %1817 = vmatmul.mubr.f32.vlgmr.msra.gmra.mxu0 %v2478_v62  ;;  %v2644_v25 = vsub.f32 %v776_v9, %v2630_v14  ;;  %v2755_v9 = vand.u32 4294901760, %v2746_v0 }
  0xca   :  { %1854 = vmatprep.subr.mxu0 %v2291_v23  ;;  %1898 = vmatpush3.msra.mxu1 %v2271_v15  ;;  %v775_v15 = vld [vmem:[#allocation5 + $0x68] sm:$0xff]  ;;  %v2641_v24 = vand.u32 4294901760, %v2628_v10 }
  0xcb   :  { %1855 = vmatpush3.msra.mxu0 %v2291_v23  ;;  %1886 = vmatprep.mubr.msk.f32.mxu0 %vm56_vm0, %v2215_v43  ;;  %v2633_v19 = vand.u32 4294901760, %v775_v15  ;;  %v771_v23 = vld [vmem:[#allocation5 + $0x48] sm:$0xff]  ;;  %2995 = vst [vmem:[#allocation12_spill] sm:$0xff] %v2755_v9 }
  0xcc   :  { %1899 = vmatprep.subr.mxu1 %v2274_v16  ;;  %1856 = vmatprep.subr.mxu0 %v2301_v26  ;;  %v890_v34 = vsub.f32 %v2628_v10, %v2641_v24 }
  0xcd   :  { %1900 = vmatpush3.msra.mxu1 %v2274_v16  ;;  %1857 = vmatpush3.msra.mxu0 %v2301_v26  ;;  %v774_v16 = vld [vmem:[#allocation5 + $0x60] sm:$0xff] }
  0xce   :  { %1901 = vmatprep.subr.mxu1 %v2276_v17  ;;  %1858 = vmatprep.subr.mxu0 %v2304_v27  ;;  %v2635_v20 = vand.u32 4294901760, %v774_v16  ;;  %v891_v53 = vand.u32 4294901760, %v890_v34 }
  0xcf   :  { %1902 = vmatpush3.msra.mxu1 %v2276_v17  ;;  %1859 = vmatpush3.msra.mxu0 %v2304_v27  ;;  %v773_v17 = vld [vmem:[#allocation5 + $0x58] sm:$0xff]  ;;  %v2649_v27 = vand.u32 4294901760, %v771_v23 }
  0xd0   :  { %1903 = vmatprep.subr.mxu1 %v2288_v22  ;;  %1860 = vmatprep.subr.mxu0 %v2307_v28  ;;  %v2637_v21 = vand.u32 4294901760, %v773_v17  ;;  %v2655_v29 = vsub.f32 %v774_v16, %v2635_v20  ;;  %v2760_v16 = vsub.f32 %v766_v55, %v2749_v5 }
  0xd1   :  { %1904 = vmatpush3.msra.mxu1 %v2288_v22  ;;  %1861 = vmatpush3.msra.mxu0 %v2307_v28  ;;  %v772_v22 = vld [vmem:[#allocation5 + $0x50] sm:$0xff]  ;;  %v2652_v28 = vsub.f32 %v775_v15, %v2633_v19  ;;  %v2757_v15 = vand.u32 4294901760, %v765_v6 }
  0xd2   :  { %1905 = vmatprep.subr.mxu1 %v2339_v46  ;;  %1862 = vmatprep.subr.mxu0 %v2316_v31  ;;  %v2647_v26 = vand.u32 4294901760, %v772_v22 }
  0xd3   :  { %1906 = vmatpush3.msra.mxu1 %v2339_v46  ;;  %1863 = vmatpush3.msra.mxu0 %v2316_v31  ;;  %v2658_v31 = vsub.f32 %v773_v17, %v2637_v21  ;;  %v2671_v46 = vsub.f32 %v771_v23, %v2649_v27  ;;  %v764_v17 = vld [vmem:[#allocation5 + $0x10] sm:$0xff]  ;;  %v960_v23 = vsub.f32 %v2746_v0, %v2755_v9 }
  0xd4   :  { %1907 = vmatprep.subr.mxu1 %v2346_v48  ;;  %1864 = vmatprep.subr.mxu0 %v2330_v38  ;;  %v2766_v34 = vsub.f32 %v765_v6, %v2757_v15 }
  0xd5   :  { %1908 = vmatpush3.msra.mxu1 %v2346_v48  ;;  %1865 = vmatpush3.msra.mxu0 %v2330_v38  ;;  %v2664_v38 = vand.u32 4294901760, %v2644_v25  ;;  %v2677_v48 = vand.u32 4294901760, %v2655_v29  ;;  %v2697_v2 = vand.u32 4294901760, %v2671_v46 }
  0xd6   :  { %1909 = vmatprep.subr.mxu1 %v2348_v49  ;;  %1866 = vmatprep.subr.mxu0 %v2334_v42 }
  0xd7   :  { %1910 = vmatpush3.msra.mxu1 %v2348_v49  ;;  %1867 = vmatpush3.msra.mxu0 %v2334_v42  ;;  %v2667_v42 = vsub.f32 %v772_v22, %v2647_v26  ;;  %v2680_v49 = vand.u32 4294901760, %v2658_v31  ;;  %v911_v60 = vsub.f32 %v2655_v29, %v2677_v48  ;;  %v932_v33 = vsub.f32 %v2671_v46, %v2697_v2 }
  0xd8   :  { %1911 = vmatprep.subr.mxu1 %v2356_v54  ;;  %1868 = vmatprep.subr.mxu0 %v2343_v47 }
  0xd9   :  { %1912 = vmatpush3.msra.mxu1 %v2356_v54  ;;  %1869 = vmatpush3.msra.mxu0 %v2343_v47  ;;  %v2674_v47 = vand.u32 4294901760, %v2652_v28  ;;  %v897_v54 = vsub.f32 %v2644_v25, %v2664_v38  ;;  %v2686_v56 = vand.u32 4294901760, %v2667_v42 }
  0xda   :  { %1913 = vmatprep.subr.mxu1 %v2371_v61  ;;  %1870 = vmatprep.subr.mxu0 %v2365_v59 }
  0xdb   :  { %1914 = vmatpush3.msra.mxu1 %v2371_v61  ;;  %1871 = vmatpush3.msra.mxu0 %v2365_v59  ;;  %v904_v59 = vsub.f32 %v2652_v28, %v2674_v47  ;;  %v898_v61 = vand.u32 4294901760, %v897_v54  ;;  %v925_v12 = vsub.f32 %v2667_v42, %v2686_v56  ;;  %v2772_v54 = vand.u32 4294901760, %v2760_v16 }
  0xdc   :  { %1915 = vmatprep.subr.mxu1 %v2383_v3  ;;  %1872 = vmatprep.subr.mxu0 %v2377_v1 }
  0xdd   :  { %1916 = vmatpush3.msra.mxu1 %v2383_v3  ;;  %1873 = vmatpush3.msra.mxu0 %v2377_v1  ;;  %v918_v1 = vsub.f32 %v2658_v31, %v2680_v49  ;;  %v905_v3 = vand.u32 4294901760, %v904_v59  ;;  %v926_v40 = vand.u32 4294901760, %v925_v12  ;;  %2996 = vst [vmem:[#allocation13_spill] sm:$0xff] %v2772_v54  ;;  %v763_v59 = vld [vmem:[#allocation5 + $0x8] sm:$0xff]  ;;  %v762_v12 = vld [vmem:[#allocation5] sm:$0xff] }
  0xde   :  { %1917 = vmatprep.subr.mxu1 %v2395_v13  ;;  %1874 = vmatprep.subr.mxu0 %v2389_v11 }
  0xdf   :  { %1918 = vmatpush3.msra.mxu1 %v2395_v13  ;;  %1875 = vmatpush3.msra.mxu0 %v2389_v11  ;;  %v912_v11 = vand.u32 4294901760, %v911_v60  ;;  %v770_v13 = vld [vmem:[#allocation5 + $0x40] sm:$0xff]  ;;  %v961_v60 = vand.u32 4294901760, %v960_v23 }
  0xe0   :  { %1919 = vmatprep.subr.mxu1 %v2407_v35  ;;  %1876 = vmatprep.subr.mxu0 %v2401_v32 }
  0xe1   :  { %1920 = vmatpush3.msra.mxu1 %v2407_v35  ;;  %1877 = vmatpush3.msra.mxu0 %v2401_v32  ;;  %v919_v32 = vand.u32 4294901760, %v918_v1  ;;  %v2707_v35 = vand.u32 4294901760, %v770_v13 }
  0xe2   :  { %1922 = vmatmul.mubr.msk.f32.vlgmr.msra.gmra.mxu1 %vm57_vm1, %v2215_v43  ;;  %1878 = vmatprep.subr.mxu0 %v2413_v39 }
  0xe3   :  { %1879 = vmatpush3.msra.mxu0 %v2413_v39  ;;  %1959 = vmatprep.subr.mxu1 %v891_v53  ;;  %v769_v39 = vld [vmem:[#allocation5 + $0x38] sm:$0xff] }
  0xe4   :  { %1880 = vmatprep.subr.mxu0 %v2423_v44  ;;  %1960 = vmatpush3.msra.mxu1 %v891_v53  ;;  %v2714_v45 = vand.u32 4294901760, %v769_v39  ;;  %v2768_v53 = vand.u32 4294901760, %v764_v17 }
  0xe5   :  { %1881 = vmatpush3.msra.mxu0 %v2423_v44  ;;  %1961 = vmatprep.subr.mxu1 %v898_v61  ;;  %v2712_v44 = vsub.f32 %v770_v13, %v2707_v35 }
  0xe6   :  { %1882 = vmatprep.subr.mxu0 %v2433_v52  ;;  %1962 = vmatpush3.msra.mxu1 %v898_v61  ;;  %v2722_v30 = vsub.f32 %v769_v39, %v2714_v45  ;;  %v2776_v61 = vand.u32 4294901760, %v2766_v34  ;;  %v2779_v1 = vsub.f32 %v764_v17, %v2768_v53  ;;  %v2795_v39 = vand.u32 4294901760, %v762_v12 }
  0xe7   :  { %1883 = vmatpush3.msra.mxu0 %v2433_v52  ;;  %1963 = vmatprep.subr.mxu1 %v905_v3  ;;  %v768_v52 = vld [vmem:[#allocation5 + $0x30] sm:$0xff]  ;;  %v2719_v18 = vand.u32 4294901760, %v2712_v44 }
  0xe8   :  { %1884 = vmatprep.subr.mxu0 %v2440_v58  ;;  %1964 = vmatpush3.msra.mxu1 %v905_v3  ;;  %v2724_v36 = vand.u32 4294901760, %v768_v52  ;;  %2997 = vst [vmem:[#allocation14_spill] sm:$0xff] %v2776_v61  ;;  %v2781_v3 = vand.u32 4294901760, %v763_v59  ;;  %v974_v13 = vsub.f32 %v2766_v34, %v2776_v61 }
  0xe9   :  { %1885 = vmatpush3.msra.mxu0 %v2440_v58  ;;  %1965 = vmatprep.subr.mxu1 %v912_v11  ;;  %v933_v58 = vand.u32 4294901760, %v932_v33  ;;  %v939_v41 = vsub.f32 %v2712_v44, %v2719_v18 }
  0xea   :  { %1887 = vmatmul.mubr.msk.f32.vlgmr.msra.gmra.mxu0 %vm57_vm1, %v2215_v43  ;;  %1924 = vmatprep.subr.mxu0 %v2625_v8  ;;  %v2731_v43 = vand.u32 4294901760, %v2722_v30  ;;  %v2734_v50 = vsub.f32 %v768_v52, %v2724_v36  ;;  %v2793_v33 = vsub.f32 %v763_v59, %v2781_v3  ;;  %v975_v52 = vand.u32 4294901760, %v974_v13 }
  0xeb   :  { %1925 = vmatpush3.msra.mxu0 %v2625_v8  ;;  %1966 = vmatpush3.msra.mxu1 %v912_v11  ;;  %v940_v57 = vand.u32 4294901760, %v939_v41  ;;  %v967_v11 = vsub.f32 %v2760_v16, %v2772_v54  ;;  %v2805_v41 = vsub.f32 %v762_v12, %v2795_v39 }
  0xec   :  { %1926 = vmatprep.subr.mxu0 %v2630_v14  ;;  %1967 = vmatprep.subr.mxu1 %v919_v32  ;;  %v946_v62 = vsub.f32 %v2722_v30, %v2731_v43  ;;  %v2743_v63 = vand.u32 4294901760, %v2734_v50  ;;  %v2802_v37 = vand.u32 4294901760, %v2793_v33 }
  0xed   :  { %1927 = vmatpush3.msra.mxu0 %v2630_v14  ;;  %1968 = vmatpush3.msra.mxu1 %v919_v32  ;;  %v2790_v32 = vand.u32 4294901760, %v2779_v1 }
  0xee   :  { %1928 = vmatprep.subr.mxu0 %v2633_v19  ;;  %1969 = vmatprep.subr.mxu1 %v926_v40  ;;  %2994 = vst [vmem:[#allocation11_spill] sm:$0xff] %v2743_v63  ;;  %v947_v7 = vand.u32 4294901760, %v946_v62  ;;  %v953_v4 = vsub.f32 %v2734_v50, %v2743_v63  ;;  %2999 = vst [vmem:[#allocation16_spill] sm:$0xff] %v2802_v37  ;;  %v2812_v62 = vand.u32 4294901760, %v2805_v41 }
  0xef   :  { %1929 = vmatpush3.msra.mxu0 %v2633_v19  ;;  %1970 = vmatpush3.msra.mxu1 %v926_v40  ;;  %2998 = vst [vmem:[#allocation15_spill] sm:$0xff] %v2790_v32  ;;  %v968_v40 = vand.u32 4294901760, %v967_v11 }
  0xf0   :  { %1930 = vmatprep.subr.mxu0 %v2635_v20  ;;  %1971 = vmatprep.subr.mxu1 %v933_v58  ;;  %v954_v22 = vand.u32 4294901760, %v953_v4  ;;  %3000 = vst [vmem:[#allocation17_spill] sm:$0xff] %v2812_v62 }
  0xf1   :  { %1931 = vmatpush3.msra.mxu0 %v2635_v20  ;;  %1972 = vmatpush3.msra.mxu1 %v933_v58  ;;  %v981_v58 = vsub.f32 %v2779_v1, %v2790_v32 }
  0xf2   :  { %1932 = vmatprep.subr.mxu0 %v2637_v21  ;;  %1973 = vmatprep.subr.mxu1 %v940_v57 }
  0xf3   :  { %1933 = vmatpush3.msra.mxu0 %v2637_v21  ;;  %1974 = vmatpush3.msra.mxu1 %v940_v57  ;;  %v982_v55 = vand.u32 4294901760, %v981_v58  ;;  %v988_v57 = vsub.f32 %v2793_v33, %v2802_v37 }
  0xf4   :  { %1934 = vmatprep.subr.mxu0 %v2647_v26  ;;  %1975 = vmatprep.subr.mxu1 %v947_v7 }
  0xf5   :  { %1935 = vmatpush3.msra.mxu0 %v2647_v26  ;;  %1976 = vmatpush3.msra.mxu1 %v947_v7  ;;  %v989_v6 = vand.u32 4294901760, %v988_v57  ;;  %v995_v7 = vsub.f32 %v2805_v41, %v2812_v62 }
  0xf6   :  { %1936 = vmatprep.subr.mxu0 %v2649_v27  ;;  %1977 = vmatprep.subr.mxu1 %v954_v22 }
  0xf7   :  { %1937 = vmatpush3.msra.mxu0 %v2649_v27  ;;  %1978 = vmatpush3.msra.mxu1 %v954_v22  ;;  %v996_v4 = vand.u32 4294901760, %v995_v7 }
  0xf8   :  { %1938 = vmatprep.subr.mxu0 %v2707_v35  ;;  %1979 = vmatprep.subr.mxu1 %v961_v60 }
  0xf9   :  { %1939 = vmatpush3.msra.mxu0 %v2707_v35  ;;  %1980 = vmatpush3.msra.mxu1 %v961_v60 }
  0xfa   :  { %1940 = vmatprep.subr.mxu0 %v2714_v45  ;;  %1981 = vmatprep.subr.mxu1 %v968_v40 }
  0xfb   :  { %1941 = vmatpush3.msra.mxu0 %v2714_v45  ;;  %1982 = vmatpush3.msra.mxu1 %v968_v40 }
  0xfc   :  { %1942 = vmatprep.subr.mxu0 %v2724_v36  ;;  %1983 = vmatprep.subr.mxu1 %v975_v52 }
  0xfd   :  { %1943 = vmatpush3.msra.mxu0 %v2724_v36  ;;  %1984 = vmatpush3.msra.mxu1 %v975_v52 }
  0xfe   :  { %1944 = vmatprep.subr.mxu0 %v2736_v51  ;;  %1985 = vmatprep.subr.mxu1 %v982_v55 }
  0xff   :  { %1945 = vmatpush3.msra.mxu0 %v2736_v51  ;;  %1986 = vmatpush3.msra.mxu1 %v982_v55 }
 0x100   :  { %1946 = vmatprep.subr.mxu0 %v2749_v5  ;;  %1987 = vmatprep.subr.mxu1 %v989_v6 }
 0x101   :  { %1947 = vmatpush3.msra.mxu0 %v2749_v5  ;;  %1988 = vmatpush3.msra.mxu1 %v989_v6 }
 0x102   :  { %1948 = vmatprep.subr.mxu0 %v2757_v15  ;;  %1989 = vmatprep.subr.mxu1 %v996_v4 }
 0x103   :  { %1949 = vmatpush3.msra.mxu0 %v2757_v15  ;;  %1990 = vmatpush3.msra.mxu1 %v996_v4 }
 0x104   :  { %1950 = vmatprep.subr.mxu0 %v2768_v53  ;;  %2029 = vmatprep.subr.mxu1 %v2625_v8 }
 0x105   :  { %1951 = vmatpush3.msra.mxu0 %v2768_v53 }
 0x106   :  { %1952 = vmatprep.subr.mxu0 %v2781_v3 }
 0x107   :  { %1953 = vmatpush3.msra.mxu0 %v2781_v3 }
 0x108   :  { %1954 = vmatprep.subr.mxu0 %v2795_v39 }
 0x109   :  { %1955 = vmatpush3.msra.mxu0 %v2795_v39 }
 0x10a   :  { %1994 = vmatprep.subr.mxu0 %v2628_v10 }
 0x15f   :  { %v1783_v22 = vpop.f32.mrf.mxu1 }
 0x161   :  { %v326_v60 = vpop.f32.mrf.mxu1 }
 0x168   :  { %v1748_v17 = vpop.f32.mrf.mxu0 }
 0x169   :  { %v333_v11 = vadd.f32 %v1783_v22, %v1748_v17 }
 0x16a   :  { %v165_v23 = vpop.f32.mrf.mxu0 }
 0x16b   :  { %v327_v40 = vadd.f32 %v326_v60, %v165_v23 }
 0x180   :  { %v1853_v12 = vpop.f32.mrf.mxu1 }
 0x182   :  { %v532_v57 = vpop.f32.mrf.mxu1 }
 0x189   :  { %v1818_v59 = vpop.f32.mrf.mxu0 }
 0x18a   :  { %v444_v52 = vadd.f32 %v1818_v59, %v333_v11 }
 0x18b   :  { %v436_v13 = vpop.f32.mrf.mxu0 }
 0x18c   :  { %v437_v58 = vadd.f32 %v436_v13, %v327_v40  ;;  %v541_v55 = vadd.f32 %v1853_v12, %v444_v52 }
 0x18e   :  { %v533_v37 = vadd.f32 %v532_v57, %v437_v58 }
 0x1a2   :  { %v1923_v7 = vpop.f32.mrf.mxu1 }
 0x1a4   :  { %v752_v54 = vpop.f32.mrf.mxu1 }
 0x1aa   :  { %v1888_v62 = vpop.f32.mrf.mxu0 }
 0x1ab   :  { %v666_v6 = vadd.f32 %v1888_v62, %v541_v55 }
 0x1ac   :  { %v659_v4 = vpop.f32.mrf.mxu0 }
 0x1ad   :  { %v759_v32 = vadd.f32 %v1923_v7, %v666_v6  ;;  %v660_v61 = vadd.f32 %v659_v4, %v533_v37 }
 0x1af   :  { %v2819_v9 = vand.u32 4294901760, %v759_v32  ;;  %v753_v63 = vadd.f32 %v752_v54, %v660_v61 }
 0x1b1   :  { %v2822_v17 = vsub.f32 %v759_v32, %v2819_v9  ;;  %v2824_v22 = vand.u32 4294901760, %v753_v63 }
 0x1b3   :  { %v878_v23 = vand.u32 4294901760, %v2822_v17  ;;  %v867_v59 = vsub.f32 %v753_v63, %v2824_v22  ;;  %1991 = vmatprep.mubr.f32.mxu1 %v2824_v22 }
 0x1b4   :  { %1992 = vmatmul.mubr.f32.vlgmr.msra.gmra.mxu1 %v2819_v9 }
 0x1b5   :  { %2030 = vmatpush3.msra.mxu1 %v2625_v8  ;;  %v868_v37 = vand.u32 4294901760, %v867_v59  ;;  %v879_v54 = vsub.f32 %v2822_v17, %v878_v23 }
 0x1b6   :  { %2031 = vmatprep.subr.mxu1 %v2630_v14 }
 0x1b7   :  { %2032 = vmatpush3.msra.mxu1 %v2630_v14  ;;  %2061 = vmatprep.mubr.f32.mxu1 %v868_v37  ;;  %v869_v61 = vsub.f32 %v867_v59, %v868_v37  ;;  %v880_v32 = vand.u32 4294901760, %v879_v54 }
 0x1b8   :  { %2033 = vmatprep.subr.mxu1 %v2633_v19 }
 0x1b9   :  { %2034 = vmatpush3.msra.mxu1 %v2633_v19  ;;  %v870_v63 = vand.u32 4294901760, %v869_v61 }
 0x1ba   :  { %2035 = vmatprep.subr.mxu1 %v2635_v20 }
 0x1bb   :  { %2036 = vmatpush3.msra.mxu1 %v2635_v20  ;;  %1956 = vmatprep.mubr.f32.mxu0 %v870_v63 }
 0x1bc   :  { %2037 = vmatprep.subr.mxu1 %v2637_v21  ;;  %1957 = vmatmul.mubr.f32.vlgmr.msra.gmra.mxu0 %v880_v32 }
 0x1bd   :  { %1995 = vmatpush3.msra.mxu0 %v2628_v10  ;;  %2038 = vmatpush3.msra.mxu1 %v2637_v21  ;;  %v3002_v10 = vld [vmem:[#allocation12_spill] sm:$0xff] }
 0x1be   :  { %1996 = vmatprep.subr.mxu0 %v2644_v25  ;;  %2026 = vmatprep.mubr.f32.mxu0 %v867_v59 }
 0x1bf   :  { %2039 = vmatprep.subr.mxu1 %v2647_v26  ;;  %1997 = vmatpush3.msra.mxu0 %v2644_v25 }
 0x1c0   :  { %2040 = vmatpush3.msra.mxu1 %v2647_v26  ;;  %1998 = vmatprep.subr.mxu0 %v2652_v28 }
 0x1c1   :  { %2041 = vmatprep.subr.mxu1 %v2649_v27  ;;  %1999 = vmatpush3.msra.mxu0 %v2652_v28 }
 0x1c2   :  { %2042 = vmatpush3.msra.mxu1 %v2649_v27  ;;  %2000 = vmatprep.subr.mxu0 %v2655_v29 }
 0x1c3   :  { %2043 = vmatprep.subr.mxu1 %v2707_v35  ;;  %2001 = vmatpush3.msra.mxu0 %v2655_v29 }
 0x1c4   :  { %2044 = vmatpush3.msra.mxu1 %v2707_v35  ;;  %2002 = vmatprep.subr.mxu0 %v2658_v31 }
 0x1c5   :  { %2045 = vmatprep.subr.mxu1 %v2714_v45  ;;  %2003 = vmatpush3.msra.mxu0 %v2658_v31 }
 0x1c6   :  { %2046 = vmatpush3.msra.mxu1 %v2714_v45  ;;  %2004 = vmatprep.subr.mxu0 %v2667_v42 }
 0x1c7   :  { %2047 = vmatprep.subr.mxu1 %v2724_v36  ;;  %2005 = vmatpush3.msra.mxu0 %v2667_v42 }
 0x1c8   :  { %2048 = vmatpush3.msra.mxu1 %v2724_v36  ;;  %2006 = vmatprep.subr.mxu0 %v2671_v46 }
 0x1c9   :  { %2049 = vmatprep.subr.mxu1 %v2736_v51  ;;  %2007 = vmatpush3.msra.mxu0 %v2671_v46 }
 0x1ca   :  { %2050 = vmatpush3.msra.mxu1 %v2736_v51  ;;  %2008 = vmatprep.subr.mxu0 %v2712_v44 }
 0x1cb   :  { %2051 = vmatprep.subr.mxu1 %v2749_v5  ;;  %2009 = vmatpush3.msra.mxu0 %v2712_v44 }
 0x1cc   :  { %2052 = vmatpush3.msra.mxu1 %v2749_v5  ;;  %2010 = vmatprep.subr.mxu0 %v2722_v30 }
 0x1cd   :  { %2053 = vmatprep.subr.mxu1 %v2757_v15  ;;  %2011 = vmatpush3.msra.mxu0 %v2722_v30 }
 0x1ce   :  { %2054 = vmatpush3.msra.mxu1 %v2757_v15  ;;  %2012 = vmatprep.subr.mxu0 %v2734_v50 }
 0x1cf   :  { %2055 = vmatprep.subr.mxu1 %v2768_v53  ;;  %2013 = vmatpush3.msra.mxu0 %v2734_v50 }
 0x1d0   :  { %2056 = vmatpush3.msra.mxu1 %v2768_v53  ;;  %2014 = vmatprep.subr.mxu0 %v2746_v0 }
 0x1d1   :  { %2057 = vmatprep.subr.mxu1 %v2781_v3  ;;  %2015 = vmatpush3.msra.mxu0 %v2746_v0 }
 0x1d2   :  { %2058 = vmatpush3.msra.mxu1 %v2781_v3  ;;  %2016 = vmatprep.subr.mxu0 %v2760_v16 }
 0x1d3   :  { %2059 = vmatprep.subr.mxu1 %v2795_v39  ;;  %2017 = vmatpush3.msra.mxu0 %v2760_v16 }
 0x1d4   :  { %2060 = vmatpush3.msra.mxu1 %v2795_v39  ;;  %2018 = vmatprep.subr.mxu0 %v2766_v34 }
 0x1d5   :  { %2062 = vmatmul.mubr.f32.vlgmr.msra.gmra.mxu1 %v878_v23  ;;  %2099 = vmatprep.subr.mxu1 %v2625_v8 }
 0x1d6   :  { %2019 = vmatpush3.msra.mxu0 %v2766_v34  ;;  %2100 = vmatpush3.msra.mxu1 %v2625_v8  ;;  %v3001_v8 = vld [vmem:[#allocation11_spill] sm:$0xff] }
 0x1d7   :  { %2131 = vmatprep.mubr.f32.mxu1 %v2824_v22  ;;  %2020 = vmatprep.subr.mxu0 %v2779_v1 }
 0x1d8   :  { %2101 = vmatprep.subr.mxu1 %v2630_v14  ;;  %2021 = vmatpush3.msra.mxu0 %v2779_v1 }
 0x1d9   :  { %2102 = vmatpush3.msra.mxu1 %v2630_v14  ;;  %2022 = vmatprep.subr.mxu0 %v2793_v33  ;;  %v3003_v14 = vld [vmem:[#allocation13_spill] sm:$0xff] }
 0x1da   :  { %2103 = vmatprep.subr.mxu1 %v2633_v19  ;;  %2023 = vmatpush3.msra.mxu0 %v2793_v33 }
 0x1db   :  { %2104 = vmatpush3.msra.mxu1 %v2633_v19  ;;  %2024 = vmatprep.subr.mxu0 %v2805_v41  ;;  %v3004_v19 = vld [vmem:[#allocation14_spill] sm:$0xff] }
 0x1dc   :  { %2105 = vmatprep.subr.mxu1 %v2635_v20  ;;  %2025 = vmatpush3.msra.mxu0 %v2805_v41 }
 0x1dd   :  { %2106 = vmatpush3.msra.mxu1 %v2635_v20  ;;  %2027 = vmatmul.mubr.f32.vlgmr.msra.gmra.mxu0 %v2822_v17  ;;  %v3005_v20 = vld [vmem:[#allocation15_spill] sm:$0xff] }
 0x1de   :  { %2064 = vmatprep.subr.mxu0 %v2641_v24  ;;  %2107 = vmatprep.subr.mxu1 %v2637_v21 }
 0x1df   :  { %2065 = vmatpush3.msra.mxu0 %v2641_v24  ;;  %2096 = vmatprep.mubr.f32.mxu0 %v2824_v22  ;;  %v3007_v24 = vld [vmem:[#allocation17_spill] sm:$0xff] }
 0x1e0   :  { %2108 = vmatpush3.msra.mxu1 %v2637_v21  ;;  %2066 = vmatprep.subr.mxu0 %v2664_v38  ;;  %v3006_v21 = vld [vmem:[#allocation16_spill] sm:$0xff] }
 0x1e1   :  { %2109 = vmatprep.subr.mxu1 %v2647_v26  ;;  %2067 = vmatpush3.msra.mxu0 %v2664_v38 }
 0x1e2   :  { %2110 = vmatpush3.msra.mxu1 %v2647_v26  ;;  %2068 = vmatprep.subr.mxu0 %v2674_v47  ;;  %v1497_v26 = vld [vmem:[%s2978_s3] ss:$0 sm:$0xff]  ;;  %s2216_s3 = smov [#allocation7]  }
 0x1e3   :  { %2111 = vmatprep.subr.mxu1 %v2649_v27  ;;  %2069 = vmatpush3.msra.mxu0 %v2674_v47  ;;  %s1476_s30 = sshll.u32 %s2216_s3, 4  ;;  %s1477_s30 = int_to_ptr.vmem [resolvable:$true] %s1476_s30 }
 0x1e4   :  { %2112 = vmatpush3.msra.mxu1 %v2649_v27  ;;  %2070 = vmatprep.subr.mxu0 %v2677_v48  ;;  %s2183_s5 = scalar_lea.vmem %s1477_s30, 256  ;;  %p2188_p11 = scmp.lt.s32.totalorder %s1477_s30, %s1477_s30 }
 0x1e5   :  { %2113 = vmatprep.subr.mxu1 %v2707_v35  ;;  %2071 = vmatpush3.msra.mxu0 %v2677_v48  ;;  %p2184_p10 = scmp.ne.s32.totalorder %s1477_s30, %s2183_s5  ;;  %p2189_p12 = scmp.lt.s32.totalorder %s2183_s5, %s2183_s5 }
 0x1e6   :  { %2114 = vmatpush3.msra.mxu1 %v2707_v35  ;;  %2072 = vmatprep.subr.mxu0 %v2680_v49 }
 0x1e7   :  { %2115 = vmatprep.subr.mxu1 %v2714_v45  ;;  %2073 = vmatpush3.msra.mxu0 %v2680_v49  ;;  %p2190_p13 = por %p2189_p12, %p2188_p11 }
 0x1e8   :  { %2116 = vmatpush3.msra.mxu1 %v2714_v45  ;;  %2074 = vmatprep.subr.mxu0 %v2686_v56 }
 0x1e9   :  { %2117 = vmatprep.subr.mxu1 %v2724_v36  ;;  %2075 = vmatpush3.msra.mxu0 %v2686_v56  ;;  %p2191_p0 = pnand %p2190_p13, %p2184_p10 }
 0x1ea   :  { %2118 = vmatpush3.msra.mxu1 %v2724_v36  ;;  %2076 = vmatprep.subr.mxu0 %v2697_v2 }
 0x1eb   :  { %2119 = vmatprep.subr.mxu1 %v2736_v51  ;;  %2077 = vmatpush3.msra.mxu0 %v2697_v2 }
 0x1ec   :  { %2120 = vmatpush3.msra.mxu1 %v2736_v51  ;;  %2078 = vmatprep.subr.mxu0 %v2719_v18 }
 0x1ed   :  { %2121 = vmatprep.subr.mxu1 %v2749_v5  ;;  %2079 = vmatpush3.msra.mxu0 %v2719_v18 }
 0x1ee   :  { %2122 = vmatpush3.msra.mxu1 %v2749_v5  ;;  %2080 = vmatprep.subr.mxu0 %v2731_v43 }
 0x1ef   :  { %2123 = vmatprep.subr.mxu1 %v2757_v15  ;;  %2081 = vmatpush3.msra.mxu0 %v2731_v43 }
 0x1f0   :  { %2124 = vmatpush3.msra.mxu1 %v2757_v15  ;;  %2082 = vmatprep.subr.mxu0 %v3001_v8 }
 0x1f1   :  { %2125 = vmatprep.subr.mxu1 %v2768_v53  ;;  %2083 = vmatpush3.msra.mxu0 %v3001_v8 }
 0x1f2   :  { %2126 = vmatpush3.msra.mxu1 %v2768_v53  ;;  %2084 = vmatprep.subr.mxu0 %v3002_v10 }
 0x1f3   :  { %2127 = vmatprep.subr.mxu1 %v2781_v3  ;;  %2085 = vmatpush3.msra.mxu0 %v3002_v10 }
 0x1f4   :  { %2128 = vmatpush3.msra.mxu1 %v2781_v3  ;;  %2086 = vmatprep.subr.mxu0 %v3003_v14 }
 0x1f5   :  { %2129 = vmatprep.subr.mxu1 %v2795_v39  ;;  %2087 = vmatpush3.msra.mxu0 %v3003_v14 }
 0x1f6   :  { %2130 = vmatpush3.msra.mxu1 %v2795_v39  ;;  %2088 = vmatprep.subr.mxu0 %v3004_v19 }
 0x1f7   :  { %2132 = vmatmul.mubr.f32.vlgmr.msra.gmra.mxu1 %v2819_v9  ;;  %2089 = vmatpush3.msra.mxu0 %v3004_v19 }
 0x1f8   :  { %2090 = vmatprep.subr.mxu0 %v3005_v20 }
 0x1f9   :  { %2091 = vmatpush3.msra.mxu0 %v3005_v20 }
 0x1fa   :  { %2092 = vmatprep.subr.mxu0 %v3006_v21 }
 0x1fb   :  { %2093 = vmatpush3.msra.mxu0 %v3006_v21 }
 0x1fc   :  { %2094 = vmatprep.subr.mxu0 %v3007_v24 }
 0x1fd   :  { %2095 = vmatpush3.msra.mxu0 %v3007_v24 }
 0x1fe   :  { %2097 = vmatmul.mubr.f32.vlgmr.msra.gmra.mxu0 %v2819_v9 }
 0x274   :  { %v1993_v27 = vpop.f32.mrf.mxu1 }
 0x276   :  { %v1033_v42 = vpop.f32.mrf.mxu1 }
 0x27c   :  { %v1958_v25 = vpop.f32.mrf.mxu0 }
 0x27d   :  { %v883_v29 = vadd.f32 %v1958_v25, %v1497_v26 }
 0x27e   :  { %v872_v28 = vpop.f32.mrf.mxu0 }
 0x27f   :  { %v873_v38 = vadd.f32 %v1497_v26, %v872_v28  ;;  %v1040_v46 = vadd.f32 %v1993_v27, %v883_v29 }
 0x281   :  { %v1034_v56 = vadd.f32 %v1033_v42, %v873_v38 }
 0x295   :  { %v2063_v47 = vpop.f32.mrf.mxu1 }
 0x297   :  { %v1239_v35 = vpop.f32.mrf.mxu1 }
 0x29d   :  { %v2028_v31 = vpop.f32.mrf.mxu0 }
 0x29e   :  { %v1151_v49 = vadd.f32 %v2028_v31, %v1040_v46 }
 0x29f   :  { %v1143_v48 = vpop.f32.mrf.mxu0 }
 0x2a0   :  { %v1144_v2 = vadd.f32 %v1143_v48, %v1034_v56  ;;  %v1248_v44 = vadd.f32 %v2063_v47, %v1151_v49 }
 0x2a2   :  { %v1240_v36 = vadd.f32 %v1239_v35, %v1144_v2 }
 0x2b7   :  { %v2133_v45 = vpop.f32.mrf.mxu1 }
 0x2b9   :  { %v1459_v0 = vpop.f32.mrf.mxu1 }
 0x2be   :  { %v2098_v18 = vpop.f32.mrf.mxu0 }
 0x2bf   :  { %v1373_v30 = vadd.f32 %v2098_v18, %v1248_v44 }
 0x2c0   :  { %v1366_v43 = vpop.f32.mrf.mxu0 }
 0x2c1   :  { %v1466_v50 = vadd.f32 %v2133_v45, %v1373_v30  ;;  %v1367_v51 = vadd.f32 %v1366_v43, %v1240_v36 }
 0x2c3   :  { %1470 = vst [vmem:[#allocation7 + $0x8] sm:$0xff] %v1466_v50  ;;  %v1460_v5 = vadd.f32 %v1459_v0, %v1367_v51 }
 0x2c5   :  { %1469 = vst [vmem:[#allocation7] sm:$0xff] %v1460_v5 }
 0x2c6   :  { %2194 = shalt.err (!%p2191_p0)
}
 0x2c7   :  { %1482 = dma.vmem_to_hbm [thread:$0]  %s1477_s30, 256, %s2979_s4, [#allocation4], %s2210_s18, %s2210_s18, %s2211_s19  }
 0x2c8   :  { %2207 = dma.done.wait [#allocation4], 256  }
 0x2c9   :  { %2208 = vsyncadd [#allocation4], 4294967040 }
 0x2ca   :  { %1486 = vsyncpa [#allocation3], 1 }
 0x2cb   :  { %1487 = vsyncpa [#allocation6], 1 }
 0x2cc   :  { %1488 = vsyncpa [#allocation4], 1 }

</bundles_post_ra>
